<compile_context>
chip_gen: v7x
topology: tpu7x:2x2x1
jax: 0.10.0
libtpu: 0.0.40
codegen_flags: <defaults>
</compile_context>

<pallas_src>
import functools

import jax
import jax.numpy as jnp
from jax.experimental import pallas as pl
from jax.experimental.pallas import tpu as pltpu

# ---------------------------------------------------------------------------
# Problem sizes (synthetic stand-ins for the dataset-derived constants).
# dataset.channels_count() -> CHANNELS ; hidden_layer_dim -> HIDDEN
# ---------------------------------------------------------------------------
CHANNELS = 24
HIDDEN = 8
BATCH = 64           # flattened rows after x.view(-1, channels); kept small
LANES = 128


def _round_up(n, m):
    return -(-n // m) * m


def _num_tensorcores():
    """Best-effort count of TensorCores reachable by one pallas_call."""
    try:
        kind = jax.devices()[0].device_kind.lower()
    except Exception:
        return 1
    # Megacore chips expose 2 TensorCores per device; v5e/v6e expose 1.
    if any(tag in kind for tag in ("v4", "v5p", "v7")):
        return 2
    return 1


def _layer_defs(channels, hidden):
    # (name, fan_in, fan_out); "lmv" is the fused [mean | log_var] head.
    return (
        ("l0", channels, 20),
        ("l1", 20, 15),
        ("l2", 15, 10),
        ("lmv", 10, 2 * hidden),
        ("d0", hidden, 10),
        ("d1", 10, 15),
        ("d2", 15, 20),
        ("d3", 20, channels),
    )


def _build_layout(channels, hidden):
    """Static row layout of the packed (rows, 128) parameter slab.

    Each weight block starts on a sublane-aligned (multiple-of-8) row and
    occupies round_up(fan_in, 8) rows; all biases live in one trailing row
    block (one row per layer).
    Returns ({name: (w_row, fan_in, fan_out, b_row)}, total_rows).
    """
    layers = _layer_defs(channels, hidden)
    layout = {}
    row = 0
    for name, fi, fo in layers:
        # Fail loudly instead of silently truncating if dims ever outgrow one
        # lane-width / one bias row.
        assert fi <= LANES and fo <= LANES, (
            f"layer {name}: fan_in={fi}, fan_out={fo} must be <= {LANES}")
        layout[name] = [row, fi, fo, -1]
        row += _round_up(fi, 8)
    bias_start = row
    for idx, (name, _, _) in enumerate(layers):
        layout[name][3] = bias_start + idx
    n_rows = bias_start + _round_up(len(layers), 8)
    return {k: tuple(v) for k, v in layout.items()}, n_rows


def pack_params(params, channels=CHANNELS, hidden=HIDDEN):
    """Pack all weights/biases into one lane-dense (rows, 128) f32 slab.

    Call ONCE (outside the per-step forward); the slab only changes when the
    parameters change.
    """
    layout, n_rows = _build_layout(channels, hidden)
    fused_w = {
        "l0": params["w0"], "l1": params["w1"], "l2": params["w2"],
        "lmv": jnp.concatenate([params["wm"], params["wv"]], axis=1),
        "d0": params["d0w"], "d1": params["d1w"],
        "d2": params["d2w"], "d3": params["d3w"],
    }
    fused_b = {
        "l0": params["b0"], "l1": params["b1"], "l2": params["b2"],
        "lmv": jnp.concatenate([params["bm"], params["bv"]], axis=1),
        "d0": params["d0b"], "d1": params["d1b"],
        "d2": params["d2b"], "d3": params["d3b"],
    }
    slab = jnp.zeros((n_rows, LANES), jnp.float32)
    for name, (w_row, fi, fo, b_row) in layout.items():
        slab = slab.at[w_row:w_row + fi, :fo].set(fused_w[name])
        slab = slab.at[b_row, :fo].set(fused_b[name][0])
    return slab


# ---------------------------------------------------------------------------
# Kernel
# ---------------------------------------------------------------------------
def vae_kernel(x_ref, eps_ref, p_ref, dec_ref, mu_ref, logvar_ref, *,
               layout, channels, hidden):
    x = x_ref[...]                       # (tile, channels)
    eps = eps_ref[...]                   # (tile, hidden)

    def linear(v, name):
        w_row, fi, fo, b_row = layout[name]      # static Python ints
        kin = v.shape[1]                         # padded fan-in carried by act
        fo_p = _round_up(fo, 8)                  # sublane/lane-aligned slices
        w = p_ref[w_row:w_row + kin, :fo_p]      # zero-cost aligned view
        b = p_ref[b_row:b_row + 1, :fo_p]
        return jnp.dot(v, w, preferred_element_type=jnp.float32) + b

    relu = lambda v: jnp.maximum(v, 0.0)

    # ---- encode ----
    h = relu(linear(x, "l0"))
    h = relu(linear(h, "l1"))
    h = relu(linear(h, "l2"))
    mv = relu(linear(h, "lmv"))          # fused [mu | log_var] head
    mu = mv[:, :hidden]
    logvar = mv[:, hidden:2 * hidden]

    # ---- reparameterize: z = mu + eps * exp(0.5 * log_var) ----
    z = mu + eps * jnp.exp(0.5 * logvar)

    # ---- decode ----
    d = relu(linear(z, "d0"))
    d = relu(linear(d, "d1"))
    d = relu(linear(d, "d2"))
    dec = jax.nn.sigmoid(linear(d, "d3"))

    # Direct stores (no lane concatenate).
    dec_ref[...] = dec[:, :channels].astype(dec_ref.dtype)
    mu_ref[...] = mu.astype(mu_ref.dtype)
    logvar_ref[...] = logvar.astype(logvar_ref.dtype)


# ---------------------------------------------------------------------------
# Wrapper
# ---------------------------------------------------------------------------
@jax.jit
def vae_forward(x, eps, slab):
    b, c = x.shape
    h = eps.shape[1]
    layout, n_rows = _build_layout(c, h)
    assert slab.shape == (n_rows, LANES), "param slab does not match layout"

    # One grid step per TensorCore: grid=(1,) on v5e/v6e, grid=(2,) on v7x.
    ntc = _num_tensorcores()
    batch_tile = _round_up(pl.cdiv(b, ntc), 8)
    bp = batch_tile * ntc
    pad = bp - b
    if pad:
        x = jnp.pad(x, ((0, pad), (0, 0)))
        eps = jnp.pad(eps, ((0, pad), (0, 0)))

    kernel = functools.partial(vae_kernel, layout=layout, channels=c, hidden=h)

    dec, mu, logvar = pl.pallas_call(
        kernel,
        out_shape=(
            jax.ShapeDtypeStruct((bp, c), jnp.float32),
            jax.ShapeDtypeStruct((bp, h), jnp.float32),
            jax.ShapeDtypeStruct((bp, h), jnp.float32),
        ),
        grid=(bp // batch_tile,),
        in_specs=[
            pl.BlockSpec((batch_tile, c), lambda i: (i, 0)),   # x tile
            pl.BlockSpec((batch_tile, h), lambda i: (i, 0)),   # eps tile
            # Whole ~76 KiB param slab, constant block index -> resident.
            pl.BlockSpec((n_rows, LANES), lambda i: (0, 0)),
        ],
        out_specs=(
            pl.BlockSpec((batch_tile, c), lambda i: (i, 0)),   # decoded
            pl.BlockSpec((batch_tile, h), lambda i: (i, 0)),   # mu
            pl.BlockSpec((batch_tile, h), lambda i: (i, 0)),   # logvar
        ),
        compiler_params=pltpu.CompilerParams(
            dimension_semantics=("parallel",)),
    )(x, eps, slab)

    if pad:
        dec, mu, logvar = dec[:b], mu[:b], logvar[:b]
    return dec, mu, logvar


# ---------------------------------------------------------------------------
# Deterministic parameter init (PyTorch nn.Linear-style uniform bounds).
# Weights stored transposed as (in, out); biases as (1, out).
# ---------------------------------------------------------------------------
def init_params(key, channels=CHANNELS, hidden=HIDDEN):
    layer_dims = {
        "0": (channels, 20),      # encoder0
        "1": (20, 15),            # encoder1
        "2": (15, 10),            # encoder2
        "m": (10, hidden),        # encoder3_mean
        "v": (10, hidden),        # encoder3_log_var
        "d0": (hidden, 10),       # decoder0
        "d1": (10, 15),           # decoder1
        "d2": (15, 20),           # decoder2
        "d3": (20, channels),     # decoder3
    }
    names = {
        "0": ("w0", "b0"), "1": ("w1", "b1"), "2": ("w2", "b2"),
        "m": ("wm", "bm"), "v": ("wv", "bv"),
        "d0": ("d0w", "d0b"), "d1": ("d1w", "d1b"),
        "d2": ("d2w", "d2b"), "d3": ("d3w", "d3b"),
    }
    params = {}
    keys = jax.random.split(key, 2 * len(layer_dims))
    for idx, (tag, (fan_in, fan_out)) in enumerate(layer_dims.items()):
        bound = 1.0 / jnp.sqrt(jnp.float32(fan_in))
        wname, bname = names[tag]
        params[wname] = jax.random.uniform(
            keys[2 * idx], (fan_in, fan_out), jnp.float32, -bound, bound)
        params[bname] = jax.random.uniform(
            keys[2 * idx + 1], (1, fan_out), jnp.float32, -bound, bound)
    return params


def vae_forward_ref(x, eps, params):
    """Pure-JAX reference (unfused) for correctness checking."""
    relu = lambda v: jnp.maximum(v, 0.0)
    h = relu(x @ params["w0"] + params["b0"])
    h = relu(h @ params["w1"] + params["b1"])
    h = relu(h @ params["w2"] + params["b2"])
    mu = relu(h @ params["wm"] + params["bm"])
    logvar = relu(h @ params["wv"] + params["bv"])
    z = mu + eps * jnp.exp(0.5 * logvar)
    d = relu(z @ params["d0w"] + params["d0b"])
    d = relu(d @ params["d1w"] + params["d1b"])
    d = relu(d @ params["d2w"] + params["d2b"])
    dec = jax.nn.sigmoid(d @ params["d3w"] + params["d3b"])
    return dec, mu, logvar


if __name__ == "__main__":
    key = jax.random.PRNGKey(0)
    kp, kx, keps = jax.random.split(key, 3)

    params = init_params(kp)
    # Pack the parameter slab ONCE, off the per-call critical path.
    slab = jax.block_until_ready(pack_params(params))

    x = jax.random.normal(kx, (BATCH, CHANNELS), jnp.float32)
    # eps ~ N(0,1) like torch.randn_like(std); drawn outside the kernel so the
    # forward is deterministic given the key.
    eps = jax.random.normal(keps, (BATCH, HIDDEN), jnp.float32)

    dec, mu, logvar = vae_forward(x, eps, slab)
    jax.block_until_ready((dec, mu, logvar))

    dec_ref, mu_ref, logvar_ref = vae_forward_ref(x, eps, params)
    assert dec.shape == (BATCH, CHANNELS)
    assert mu.shape == (BATCH, HIDDEN) and logvar.shape == (BATCH, HIDDEN)
    assert jnp.allclose(dec, dec_ref, atol=2e-5, rtol=2e-5)
    assert jnp.allclose(mu, mu_ref, atol=2e-5, rtol=2e-5)
    assert jnp.allclose(logvar, logvar_ref, atol=2e-5, rtol=2e-5)

    print("KERNEL_OK")
</pallas_src>

<mosaic_0001>
module attributes {stable_mosaic.version = 11 : i64} {
  func.func @vae_kernel(%arg0: i32, %arg1: memref<64x24xf32, #tpu.memory_space<vmem>>, %arg2: memref<64x8xf32, #tpu.memory_space<vmem>>, %arg3: memref<152x128xf32, #tpu.memory_space<vmem>>, %arg4: memref<64x24xf32, #tpu.memory_space<vmem>>, %arg5: memref<64x8xf32, #tpu.memory_space<vmem>>, %arg6: memref<64x8xf32, #tpu.memory_space<vmem>>) attributes {dimension_semantics = [#tpu.dimension_semantics<parallel>], iteration_bounds = array<i64: 1>, scalar_prefetch = 0 : i64, scratch_operands = 0 : i64, tpu.core_type = #tpu.core_type<tc>, window_params = [{transform_indices = @transform_0, window_bounds = array<i64: 64, 24>}, {transform_indices = @transform_1, window_bounds = array<i64: 64, 8>}, {pipeline_mode = #tpu.pipeline_mode<synchronous>, transform_indices = @transform_2, window_bounds = array<i64: 152, 128>}, {transform_indices = @transform_3, window_bounds = array<i64: 64, 24>}, {transform_indices = @transform_4, window_bounds = array<i64: 64, 8>}, {transform_indices = @transform_5, window_bounds = array<i64: 64, 8>}]} {
    %c0 = arith.constant 0 : index
    %c0_0 = arith.constant 0 : index
    %0 = vector.load %arg1[%c0, %c0_0] : memref<64x24xf32, #tpu.memory_space<vmem>>, vector<64x24xf32>
    %c0_1 = arith.constant 0 : index
    %c0_2 = arith.constant 0 : index
    %1 = vector.load %arg2[%c0_1, %c0_2] : memref<64x8xf32, #tpu.memory_space<vmem>>, vector<64x8xf32>
    %c0_3 = arith.constant 0 : index
    %c0_4 = arith.constant 0 : index
    %2 = vector.load %arg3[%c0_3, %c0_4] : memref<152x128xf32, #tpu.memory_space<vmem>>, vector<24x24xf32>
    %c144 = arith.constant 144 : index
    %c0_5 = arith.constant 0 : index
    %3 = vector.load %arg3[%c144, %c0_5] : memref<152x128xf32, #tpu.memory_space<vmem>>, vector<1x24xf32>
    %cst = arith.constant dense<0.000000e+00> : vector<64x24xf32>
    %4 = tpu.matmul %0, %2, %cst {dimension_numbers = #tpu.dot_dimension_numbers<[1], [0], [0], [1], [0, 0, 1, 1], [], []>} : vector<64x24xf32>, vector<24x24xf32>, vector<64x24xf32> -> vector<64x24xf32>
    %5 = vector.broadcast %3 : vector<1x24xf32> to vector<64x24xf32>
    %6 = arith.addf %4, %5 : vector<64x24xf32>
    %cst_6 = arith.constant 0.000000e+00 : f32
    %7 = vector.broadcast %cst_6 : f32 to vector<64x24xf32>
    %8 = arith.maximumf %6, %7 : vector<64x24xf32>
    %c24 = arith.constant 24 : index
    %c0_7 = arith.constant 0 : index
    %9 = vector.load %arg3[%c24, %c0_7] : memref<152x128xf32, #tpu.memory_space<vmem>>, vector<24x16xf32>
    %c145 = arith.constant 145 : index
    %c0_8 = arith.constant 0 : index
    %10 = vector.load %arg3[%c145, %c0_8] : memref<152x128xf32, #tpu.memory_space<vmem>>, vector<1x16xf32>
    %cst_9 = arith.constant dense<0.000000e+00> : vector<64x16xf32>
    %11 = tpu.matmul %8, %9, %cst_9 {dimension_numbers = #tpu.dot_dimension_numbers<[1], [0], [0], [1], [0, 0, 1, 1], [], []>} : vector<64x24xf32>, vector<24x16xf32>, vector<64x16xf32> -> vector<64x16xf32>
    %12 = vector.broadcast %10 : vector<1x16xf32> to vector<64x16xf32>
    %13 = arith.addf %11, %12 : vector<64x16xf32>
    %cst_10 = arith.constant 0.000000e+00 : f32
    %14 = vector.broadcast %cst_10 : f32 to vector<64x16xf32>
    %15 = arith.maximumf %13, %14 : vector<64x16xf32>
    %c48 = arith.constant 48 : index
    %c0_11 = arith.constant 0 : index
    %16 = vector.load %arg3[%c48, %c0_11] : memref<152x128xf32, #tpu.memory_space<vmem>>, vector<16x16xf32>
    %c146 = arith.constant 146 : index
    %c0_12 = arith.constant 0 : index
    %17 = vector.load %arg3[%c146, %c0_12] : memref<152x128xf32, #tpu.memory_space<vmem>>, vector<1x16xf32>
    %cst_13 = arith.constant dense<0.000000e+00> : vector<64x16xf32>
    %18 = tpu.matmul %15, %16, %cst_13 {dimension_numbers = #tpu.dot_dimension_numbers<[1], [0], [0], [1], [0, 0, 1, 1], [], []>} : vector<64x16xf32>, vector<16x16xf32>, vector<64x16xf32> -> vector<64x16xf32>
    %19 = vector.broadcast %17 : vector<1x16xf32> to vector<64x16xf32>
    %20 = arith.addf %18, %19 : vector<64x16xf32>
    %cst_14 = arith.constant 0.000000e+00 : f32
    %21 = vector.broadcast %cst_14 : f32 to vector<64x16xf32>
    %22 = arith.maximumf %20, %21 : vector<64x16xf32>
    %c64 = arith.constant 64 : index
    %c0_15 = arith.constant 0 : index
    %23 = vector.load %arg3[%c64, %c0_15] : memref<152x128xf32, #tpu.memory_space<vmem>>, vector<16x16xf32>
    %c147 = arith.constant 147 : index
    %c0_16 = arith.constant 0 : index
    %24 = vector.load %arg3[%c147, %c0_16] : memref<152x128xf32, #tpu.memory_space<vmem>>, vector<1x16xf32>
    %cst_17 = arith.constant dense<0.000000e+00> : vector<64x16xf32>
    %25 = tpu.matmul %22, %23, %cst_17 {dimension_numbers = #tpu.dot_dimension_numbers<[1], [0], [0], [1], [0, 0, 1, 1], [], []>} : vector<64x16xf32>, vector<16x16xf32>, vector<64x16xf32> -> vector<64x16xf32>
    %26 = vector.broadcast %24 : vector<1x16xf32> to vector<64x16xf32>
    %27 = arith.addf %25, %26 : vector<64x16xf32>
    %cst_18 = arith.constant 0.000000e+00 : f32
    %28 = vector.broadcast %cst_18 : f32 to vector<64x16xf32>
    %29 = arith.maximumf %27, %28 : vector<64x16xf32>
    %30 = vector.extract_strided_slice %29 {offsets = [0, 0], sizes = [64, 8], strides = [1, 1]} : vector<64x16xf32> to vector<64x8xf32>
    %31 = vector.extract_strided_slice %29 {offsets = [0, 8], sizes = [64, 8], strides = [1, 1]} : vector<64x16xf32> to vector<64x8xf32>
    %cst_19 = arith.constant 5.000000e-01 : f32
    %32 = vector.broadcast %cst_19 : f32 to vector<64x8xf32>
    %33 = arith.mulf %32, %31 : vector<64x8xf32>
    %34 = math.exp %33 : vector<64x8xf32>
    %35 = arith.mulf %1, %34 : vector<64x8xf32>
    %36 = arith.addf %30, %35 : vector<64x8xf32>
    %c80 = arith.constant 80 : index
    %c0_20 = arith.constant 0 : index
    %37 = vector.load %arg3[%c80, %c0_20] : memref<152x128xf32, #tpu.memory_space<vmem>>, vector<8x16xf32>
    %c148 = arith.constant 148 : index
    %c0_21 = arith.constant 0 : index
    %38 = vector.load %arg3[%c148, %c0_21] : memref<152x128xf32, #tpu.memory_space<vmem>>, vector<1x16xf32>
    %cst_22 = arith.constant dense<0.000000e+00> : vector<64x16xf32>
    %39 = tpu.matmul %36, %37, %cst_22 {dimension_numbers = #tpu.dot_dimension_numbers<[1], [0], [0], [1], [0, 0, 1, 1], [], []>} : vector<64x8xf32>, vector<8x16xf32>, vector<64x16xf32> -> vector<64x16xf32>
    %40 = vector.broadcast %38 : vector<1x16xf32> to vector<64x16xf32>
    %41 = arith.addf %39, %40 : vector<64x16xf32>
    %cst_23 = arith.constant 0.000000e+00 : f32
    %42 = vector.broadcast %cst_23 : f32 to vector<64x16xf32>
    %43 = arith.maximumf %41, %42 : vector<64x16xf32>
    %c88 = arith.constant 88 : index
    %c0_24 = arith.constant 0 : index
    %44 = vector.load %arg3[%c88, %c0_24] : memref<152x128xf32, #tpu.memory_space<vmem>>, vector<16x16xf32>
    %c149 = arith.constant 149 : index
    %c0_25 = arith.constant 0 : index
    %45 = vector.load %arg3[%c149, %c0_25] : memref<152x128xf32, #tpu.memory_space<vmem>>, vector<1x16xf32>
    %cst_26 = arith.constant dense<0.000000e+00> : vector<64x16xf32>
    %46 = tpu.matmul %43, %44, %cst_26 {dimension_numbers = #tpu.dot_dimension_numbers<[1], [0], [0], [1], [0, 0, 1, 1], [], []>} : vector<64x16xf32>, vector<16x16xf32>, vector<64x16xf32> -> vector<64x16xf32>
    %47 = vector.broadcast %45 : vector<1x16xf32> to vector<64x16xf32>
    %48 = arith.addf %46, %47 : vector<64x16xf32>
    %cst_27 = arith.constant 0.000000e+00 : f32
    %49 = vector.broadcast %cst_27 : f32 to vector<64x16xf32>
    %50 = arith.maximumf %48, %49 : vector<64x16xf32>
    %c104 = arith.constant 104 : index
    %c0_28 = arith.constant 0 : index
    %51 = vector.load %arg3[%c104, %c0_28] : memref<152x128xf32, #tpu.memory_space<vmem>>, vector<16x24xf32>
    %c150 = arith.constant 150 : index
    %c0_29 = arith.constant 0 : index
    %52 = vector.load %arg3[%c150, %c0_29] : memref<152x128xf32, #tpu.memory_space<vmem>>, vector<1x24xf32>
    %cst_30 = arith.constant dense<0.000000e+00> : vector<64x24xf32>
    %53 = tpu.matmul %50, %51, %cst_30 {dimension_numbers = #tpu.dot_dimension_numbers<[1], [0], [0], [1], [0, 0, 1, 1], [], []>} : vector<64x16xf32>, vector<16x24xf32>, vector<64x24xf32> -> vector<64x24xf32>
    %54 = vector.broadcast %52 : vector<1x24xf32> to vector<64x24xf32>
    %55 = arith.addf %53, %54 : vector<64x24xf32>
    %cst_31 = arith.constant 0.000000e+00 : f32
    %56 = vector.broadcast %cst_31 : f32 to vector<64x24xf32>
    %57 = arith.maximumf %55, %56 : vector<64x24xf32>
    %c120 = arith.constant 120 : index
    %c0_32 = arith.constant 0 : index
    %58 = vector.load %arg3[%c120, %c0_32] : memref<152x128xf32, #tpu.memory_space<vmem>>, vector<24x24xf32>
    %c151 = arith.constant 151 : index
    %c0_33 = arith.constant 0 : index
    %59 = vector.load %arg3[%c151, %c0_33] : memref<152x128xf32, #tpu.memory_space<vmem>>, vector<1x24xf32>
    %cst_34 = arith.constant dense<0.000000e+00> : vector<64x24xf32>
    %60 = tpu.matmul %57, %58, %cst_34 {dimension_numbers = #tpu.dot_dimension_numbers<[1], [0], [0], [1], [0, 0, 1, 1], [], []>} : vector<64x24xf32>, vector<24x24xf32>, vector<64x24xf32> -> vector<64x24xf32>
    %61 = vector.broadcast %59 : vector<1x24xf32> to vector<64x24xf32>
    %62 = arith.addf %60, %61 : vector<64x24xf32>
    %63 = arith.negf %62 : vector<64x24xf32>
    %64 = math.exp %63 : vector<64x24xf32>
    %cst_35 = arith.constant 1.000000e+00 : f32
    %65 = vector.broadcast %cst_35 : f32 to vector<64x24xf32>
    %66 = arith.addf %65, %64 : vector<64x24xf32>
    %67 = arith.divf %65, %66 : vector<64x24xf32>
    %c0_36 = arith.constant 0 : index
    %c0_37 = arith.constant 0 : index
    %68 = vector.load %arg4[%c0_36, %c0_37] : memref<64x24xf32, #tpu.memory_space<vmem>>, vector<64x24xf32>
    tpu.vector_store %arg4[%c0_36, %c0_37], %67 {strides = array<i32>} : memref<64x24xf32, #tpu.memory_space<vmem>>, vector<64x24xf32>,
    %c0_38 = arith.constant 0 : index
    %c0_39 = arith.constant 0 : index
    %69 = vector.load %arg5[%c0_38, %c0_39] : memref<64x8xf32, #tpu.memory_space<vmem>>, vector<64x8xf32>
    tpu.vector_store %arg5[%c0_38, %c0_39], %30 {strides = array<i32>} : memref<64x8xf32, #tpu.memory_space<vmem>>, vector<64x8xf32>,
    %c0_40 = arith.constant 0 : index
    %c0_41 = arith.constant 0 : index
    %70 = vector.load %arg6[%c0_40, %c0_41] : memref<64x8xf32, #tpu.memory_space<vmem>>, vector<64x8xf32>
    tpu.vector_store %arg6[%c0_40, %c0_41], %31 {strides = array<i32>} : memref<64x8xf32, #tpu.memory_space<vmem>>, vector<64x8xf32>,
    return
  }
  func.func @transform_0(%arg0: i32) -> (i32, i32) {
    %c0_i32 = arith.constant 0 : i32
    %c0_i32_0 = arith.constant 0 : i32
    return %arg0, %c0_i32 : i32, i32
  }
  func.func @transform_1(%arg0: i32) -> (i32, i32) {
    %c0_i32 = arith.constant 0 : i32
    %c0_i32_0 = arith.constant 0 : i32
    return %arg0, %c0_i32 : i32, i32
  }
  func.func @transform_2(%arg0: i32) -> (i32, i32) {
    %c0_i32 = arith.constant 0 : i32
    %c0_i32_0 = arith.constant 0 : i32
    %c0_i32_1 = arith.constant 0 : i32
    return %c0_i32, %c0_i32_0 : i32, i32
  }
  func.func @transform_3(%arg0: i32) -> (i32, i32) {
    %c0_i32 = arith.constant 0 : i32
    %c0_i32_0 = arith.constant 0 : i32
    return %arg0, %c0_i32 : i32, i32
  }
  func.func @transform_4(%arg0: i32) -> (i32, i32) {
    %c0_i32 = arith.constant 0 : i32
    %c0_i32_0 = arith.constant 0 : i32
    return %arg0, %c0_i32 : i32, i32
  }
  func.func @transform_5(%arg0: i32) -> (i32, i32) {
    %c0_i32 = arith.constant 0 : i32
    %c0_i32_0 = arith.constant 0 : i32
    return %arg0, %c0_i32 : i32, i32
  }
}

</mosaic_0001>

<bundles_post_ra>
// kernel: vae_forward.1
= control target key start
LH: loop header
LB: loop body
LE: loop exit
PB: predicated region body
PF: predicated region fallthrough
CT: control target
= control target key end

     0   :  { %vm41_vm0 = vcmask 195584   ;;  %vm331_vm1 = vcmask 130048   ;;  %vm691_vm2 = vcmask 64512   ;;  %s1741_s28 = smov 120   ;;  %s2122_s2 = inlined_call_operand.vmem [shape: f32[152,128], index: 2, kind: input, shape index: {}]   ;;  %s2123_s0 = inlined_call_operand.vmem [shape: f32[64,24], index: 0, kind: input, shape index: {}]   ;;  %s2124_s4 = inlined_call_operand.vmem [shape: f32[64,8], index: 4, kind: output, shape index: {1}]   ;;  %s2125_s1 = inlined_call_operand.vmem [shape: f32[64,8], index: 1, kind: input, shape index: {}]   ;;  %s2126_s5 = inlined_call_operand.vmem [shape: f32[64,8], index: 5, kind: output, shape index: {2}]   ;;  %s2127_s3 = inlined_call_operand.vmem [shape: f32[64,24], index: 3, kind: output, shape index: {0}]  }
   0x1   :  { %v33_v0 = vld [vmem:[%s2122_s2] sm:$0xff]  ;;  %v34_v1 = vld [vmem:[%s2122_s2 + $0x8] sm:$0xff]  ;;  %v35_v4 = vld [vmem:[%s2122_s2 + $0x10] sm:$0xff] }
   0x2   :  { %v1664_v2 = vpack.c.bf16 %v34_v1, %v33_v0  ;;  %v17_v3 = vld [vmem:[%s2123_s0] sm:$0xff]  ;;  %v18_v5 = vld [vmem:[%s2123_s0 + $0x8] sm:$0xff]  ;;  %v19_v6 = vld [vmem:[%s2123_s0 + $0x10] sm:$0xff] }
   0x3   :  { %1538 = vmatprep.mubr.msk.f32.mxu0 %vm41_vm0, %v17_v3  ;;  %v20_v7 = vld [vmem:[%s2123_s0 + $0x18] sm:$0xff]  ;;  %v21_v8 = vld [vmem:[%s2123_s0 + $0x20] sm:$0xff]  ;;  %v22_v9 = vld [vmem:[%s2123_s0 + $0x28] sm:$0xff] }
   0x4   :  { %1665 = vmatprep.subr.bf16.mxu0 %v1664_v2  ;;  %v23_v10 = vld [vmem:[%s2123_s0 + $0x30] sm:$0xff]  ;;  %v24_v11 = vld [vmem:[%s2123_s0 + $0x38] sm:$0xff]  ;;  %v180_v13 = vld [vmem:[%s2122_s2 + $0x20] sm:$0xff] }
   0x5   :  { %1667 = vmatpush3.bf16.msra.mxu0 %v1664_v2  ;;  %v179_v12 = vld [vmem:[%s2122_s2 + $0x18] sm:$0xff]  ;;  %v181_v15 = vld [vmem:[%s2122_s2 + $0x28] sm:$0xff]  ;;  %v324_v16 = vld [vmem:[%s2122_s2 + $0x30] sm:$0xff] }
   0x6   :  { %1536 = vmatprep.subr.mxu0 %v35_v4  ;;  %v1668_v14 = vpack.c.bf16 %v180_v13, %v179_v12  ;;  %v325_v17 = vld [vmem:[%s2122_s2 + $0x38] sm:$0xff]  ;;  %v1370_v19 = vld [vmem:[%s2122_s2 + $0x90] ss:$0 sm:$0xff]  ;;  %v469_v44 = vld [vmem:[%s2122_s2 + $0x40] sm:$0xff] }
   0x7   :  { %v1672_v18 = vpack.c.bf16 %v325_v17, %v324_v16  ;;  %v470_v45 = vld [vmem:[%s2122_s2 + $0x48] sm:$0xff]  ;;  %v1379_v47 = vld [vmem:[%s2122_s2 + $0x91] ss:$0 sm:$0xff] }
   0x8   :  { %1669 = vmatprep.subr.bf16.mxu1 %v1668_v14  ;;  %v1676_v46 = vpack.c.bf16 %v470_v45, %v469_v44 }
   0x9   :  { %1537 = vmatpush3.msra.mxu0 %v35_v4  ;;  %1671 = vmatpush3.bf16.msra.mxu1 %v1668_v14 }
   0xa   :  { %1539 = vmatmul.mubr.msk.f32.vlgmr.msra.gmra.mrb[0].mxu0 %vm41_vm0, %v18_v5  ;;  %1554 = vmatprep.subr.mxu1 %v181_v15 }
   0xb   :  { %1541 = vmatprep.mubr.msk.f32.mxu0 %vm41_vm0, %v19_v6  ;;  %1673 = vmatprep.subr.bf16.mxu0 %v1672_v18 }
   0xc   :  { %1675 = vmatpush3.bf16.msra.mxu0 %v1672_v18 }
   0xd   :  { %1555 = vmatpush3.msra.mxu1 %v181_v15 }
   0xe   :  { %1542 = vmatmul.mubr.msk.f32.gmra.mrb[2].mxu0 %vm41_vm0, %v20_v7  ;;  %1677 = vmatprep.subr.bf16.mxu1 %v1676_v46 }
   0xf   :  { %1544 = vmatprep.mubr.msk.f32.mxu0 %vm41_vm0, %v21_v8  ;;  %v1388_v8 = vld [vmem:[%s2122_s2 + $0x92] ss:$0 sm:$0xff] }
  0x12   :  { %1545 = vmatmul.mubr.msk.f32.gmra.mrb[4].mxu0 %vm41_vm0, %v22_v9 }
  0x13   :  { %1547 = vmatprep.mubr.msk.f32.mxu0 %vm41_vm0, %v23_v10 }
  0x16   :  { %1548 = vmatmul.mubr.msk.f32.gmra.mrb[6].mxu0 %vm41_vm0, %v24_v11 }
  0xdd   :  { %v1540_v20 = vpop.f32.mrb[0].mxu0 }
  0xde   :  { %v138_v21 = vadd.f32 %v1540_v20, %v1370_v19  ;;  %v132_v22 = vpop.f32.mrb[1].mxu0 }
  0xdf   :  { %v133_v23 = vadd.f32 %v1370_v19, %v132_v22 }
  0xe0   :  { %v172_v26 = vmax.f32 %v138_v21, 0.0 }
  0xe1   :  { %v171_v24 = vmax.f32 %v133_v23, 0.0  ;;  %v1543_v25 = vpop.f32.mrb[2].mxu0 }
  0xe2   :  { %v148_v27 = vadd.f32 %v1543_v25, %v1370_v19  ;;  %v142_v28 = vpop.f32.mrb[3].mxu0 }
  0xe3   :  { %v143_v29 = vadd.f32 %v1370_v19, %v142_v28  ;;  %1556 = vmatprep.mubr.msk.f32.mxu1 %vm41_vm0, %v171_v24 }
  0xe4   :  { %1557 = vmatmul.mubr.msk.f32.vlgmr.msra.gmra.mrb[0].mxu1 %vm41_vm0, %v172_v26  ;;  %v174_v32 = vmax.f32 %v148_v27, 0.0 }
  0xe5   :  { %v173_v30 = vmax.f32 %v143_v29, 0.0  ;;  %v1546_v31 = vpop.f32.mrb[4].mxu0  ;;  %1679 = vmatpush3.bf16.msra.mxu1 %v1676_v46 }
  0xe6   :  { %v158_v33 = vadd.f32 %v1546_v31, %v1370_v19  ;;  %v152_v34 = vpop.f32.mrb[5].mxu0 }
  0xe7   :  { %v153_v35 = vadd.f32 %v1370_v19, %v152_v34  ;;  %1559 = vmatprep.mubr.msk.f32.mxu1 %vm41_vm0, %v173_v30  ;;  %v1397_v34 = vld [vmem:[%s2122_s2 + $0x93] ss:$0 sm:$0xff] }
  0xe8   :  { %v176_v36 = vmax.f32 %v158_v33, 0.0  ;;  %1560 = vmatmul.mubr.msk.f32.gmra.mrb[2].mxu1 %vm41_vm0, %v174_v32  ;;  %v685_v33 = vld [vmem:[%s2122_s2 + $0x50] sm:$0xff] }
  0xe9   :  { %v175_v37 = vmax.f32 %v153_v35, 0.0  ;;  %v1549_v38 = vpop.f32.mrb[6].mxu0  ;;  %1600 = vmatprep.subr.mxu0 %v685_v33 }
  0xea   :  { %v168_v39 = vadd.f32 %v1549_v38, %v1370_v19  ;;  %v162_v40 = vpop.f32.mrb[7].mxu0 }
  0xeb   :  { %v163_v41 = vadd.f32 %v1370_v19, %v162_v40  ;;  %1562 = vmatprep.mubr.msk.f32.mxu1 %vm41_vm0, %v175_v37 }
  0xec   :  { %v178_v42 = vmax.f32 %v168_v39, 0.0  ;;  %1563 = vmatmul.mubr.msk.f32.gmra.mrb[4].mxu1 %vm41_vm0, %v176_v36 }
  0xed   :  { %v177_v43 = vmax.f32 %v163_v41, 0.0 }
  0xef   :  { %1565 = vmatprep.mubr.msk.f32.mxu1 %vm41_vm0, %v177_v43 }
  0xf0   :  { %1566 = vmatmul.mubr.msk.f32.gmra.mrb[6].mxu1 %vm41_vm0, %v178_v42 }
 0x1b7   :  { %v1558_v48 = vpop.f32.mrb[0].mxu1 }
 0x1b8   :  { %v283_v49 = vadd.f32 %v1558_v48, %v1379_v47  ;;  %v277_v50 = vpop.f32.mrb[1].mxu1 }
 0x1b9   :  { %v278_v51 = vadd.f32 %v1379_v47, %v277_v50 }
 0x1ba   :  { %v317_v54 = vmax.f32 %v283_v49, 0.0 }
 0x1bb   :  { %v316_v52 = vmax.f32 %v278_v51, 0.0  ;;  %v1561_v53 = vpop.f32.mrb[2].mxu1 }
 0x1bc   :  { %v293_v55 = vadd.f32 %v1561_v53, %v1379_v47  ;;  %v287_v56 = vpop.f32.mrb[3].mxu1 }
 0x1bd   :  { %v288_v57 = vadd.f32 %v1379_v47, %v287_v56  ;;  %1572 = vmatprep.mubr.msk.f32.mxu0 %vm331_vm1, %v316_v52 }
 0x1be   :  { %1573 = vmatmul.mubr.msk.f32.vlgmr.msra.gmra.mrb[8].mxu0 %vm331_vm1, %v317_v54  ;;  %v319_v60 = vmax.f32 %v293_v55, 0.0 }
 0x1bf   :  { %v318_v58 = vmax.f32 %v288_v57, 0.0  ;;  %v1564_v59 = vpop.f32.mrb[4].mxu1  ;;  %1601 = vmatpush3.msra.mxu0 %v685_v33  ;;  %v29_v33 = vld [vmem:[%s2125_s1 + $0x20] sm:$0xff] }
 0x1c0   :  { %v303_v61 = vadd.f32 %v1564_v59, %v1379_v47  ;;  %v297_v62 = vpop.f32.mrb[5].mxu1 }
 0x1c1   :  { %v298_v63 = vadd.f32 %v1379_v47, %v297_v62  ;;  %1575 = vmatprep.mubr.msk.f32.mxu0 %vm331_vm1, %v318_v58 }
 0x1c2   :  { %v321_v0 = vmax.f32 %v303_v61, 0.0  ;;  %1576 = vmatmul.mubr.msk.f32.gmra.mrb[10].mxu0 %vm331_vm1, %v319_v60 }
 0x1c3   :  { %v320_v1 = vmax.f32 %v298_v63, 0.0  ;;  %v1567_v2 = vpop.f32.mrb[6].mxu1 }
 0x1c4   :  { %v313_v3 = vadd.f32 %v1567_v2, %v1379_v47  ;;  %v307_v4 = vpop.f32.mrb[7].mxu1 }
 0x1c5   :  { %v308_v5 = vadd.f32 %v1379_v47, %v307_v4  ;;  %1578 = vmatprep.mubr.msk.f32.mxu0 %vm331_vm1, %v320_v1 }
 0x1c6   :  { %v323_v6 = vmax.f32 %v313_v3, 0.0  ;;  %1579 = vmatmul.mubr.msk.f32.gmra.mrb[12].mxu0 %vm331_vm1, %v321_v0 }
 0x1c7   :  { %v322_v7 = vmax.f32 %v308_v5, 0.0 }
 0x1c9   :  { %1581 = vmatprep.mubr.msk.f32.mxu0 %vm331_vm1, %v322_v7 }
 0x1ca   :  { %1582 = vmatmul.mubr.msk.f32.gmra.mrb[14].mxu0 %vm331_vm1, %v323_v6 }
 0x291   :  { %v1574_v9 = vpop.f32.mrb[8].mxu0 }
 0x292   :  { %v428_v10 = vadd.f32 %v1574_v9, %v1388_v8  ;;  %v422_v11 = vpop.f32.mrb[9].mxu0 }
 0x293   :  { %v423_v12 = vadd.f32 %v1388_v8, %v422_v11 }
 0x294   :  { %v462_v15 = vmax.f32 %v428_v10, 0.0 }
 0x295   :  { %v461_v13 = vmax.f32 %v423_v12, 0.0  ;;  %v1577_v14 = vpop.f32.mrb[10].mxu0 }
 0x296   :  { %v438_v16 = vadd.f32 %v1577_v14, %v1388_v8  ;;  %v432_v17 = vpop.f32.mrb[11].mxu0 }
 0x297   :  { %v433_v18 = vadd.f32 %v1388_v8, %v432_v17  ;;  %1588 = vmatprep.mubr.msk.f32.mxu1 %vm331_vm1, %v461_v13 }
 0x298   :  { %1589 = vmatmul.mubr.msk.f32.vlgmr.msra.gmra.mrb[8].mxu1 %vm331_vm1, %v462_v15  ;;  %v464_v21 = vmax.f32 %v438_v16, 0.0 }
 0x299   :  { %v463_v19 = vmax.f32 %v433_v18, 0.0  ;;  %v1580_v20 = vpop.f32.mrb[12].mxu0 }
 0x29a   :  { %v448_v22 = vadd.f32 %v1580_v20, %v1388_v8  ;;  %v442_v23 = vpop.f32.mrb[13].mxu0  ;;  %v830_v20 = vld [vmem:[%s2122_s2 + $0x60] sm:$0xff] }
 0x29b   :  { %v443_v24 = vadd.f32 %v1388_v8, %v442_v23  ;;  %1591 = vmatprep.mubr.msk.f32.mxu1 %vm331_vm1, %v463_v19  ;;  %v829_v19 = vld [vmem:[%s2122_s2 + $0x58] sm:$0xff] }
 0x29c   :  { %1592 = vmatmul.mubr.msk.f32.gmra.mrb[10].mxu1 %vm331_vm1, %v464_v21  ;;  %v466_v27 = vmax.f32 %v448_v22, 0.0  ;;  %v1680_v21 = vpack.c.bf16 %v830_v20, %v829_v19  ;;  %v25_v22 = vld [vmem:[%s2125_s1] sm:$0xff] }
 0x29d   :  { %v465_v25 = vmax.f32 %v443_v24, 0.0  ;;  %v1583_v26 = vpop.f32.mrb[14].mxu0 }
 0x29e   :  { %v458_v28 = vadd.f32 %v1583_v26, %v1388_v8  ;;  %v452_v29 = vpop.f32.mrb[15].mxu0  ;;  %1681 = vmatprep.subr.bf16.mxu1 %v1680_v21  ;;  %v26_v26 = vld [vmem:[%s2125_s1 + $0x8] sm:$0xff] }
 0x29f   :  { %v453_v30 = vadd.f32 %v1388_v8, %v452_v29  ;;  %1594 = vmatprep.mubr.msk.f32.mxu1 %vm331_vm1, %v465_v25  ;;  %1683 = vmatpush3.bf16.msra.mxu1 %v1680_v21  ;;  %v27_v25 = vld [vmem:[%s2125_s1 + $0x10] sm:$0xff] }
 0x2a0   :  { %1595 = vmatmul.mubr.msk.f32.gmra.mrb[12].mxu1 %vm331_vm1, %v466_v27  ;;  %v468_v32 = vmax.f32 %v458_v28, 0.0 }
 0x2a1   :  { %v467_v31 = vmax.f32 %v453_v30, 0.0 }
 0x2a3   :  { %1597 = vmatprep.mubr.msk.f32.mxu1 %vm331_vm1, %v467_v31 }
 0x2a4   :  { %1598 = vmatmul.mubr.msk.f32.gmra.mrb[14].mxu1 %vm331_vm1, %v468_v32  ;;  %v28_v32 = vld [vmem:[%s2125_s1 + $0x18] sm:$0xff] }
 0x36b   :  { %v1590_v35 = vpop.f32.mrb[8].mxu1 }
 0x36c   :  { %v572_v36 = vadd.f32 %v1590_v35, %v1397_v34  ;;  %v566_v37 = vpop.f32.mrb[9].mxu1 }
 0x36d   :  { %v567_v38 = vadd.f32 %v1397_v34, %v566_v37 }
 0x36e   :  { %v1873_v39 = vmax.f32 %v572_v36, 0.0 }
 0x36f   :  { %v1875_v40 = vmax.f32 %v567_v38, 0.0  ;;  %v1593_v41 = vpop.f32.mrb[10].mxu1 }
 0x370   :  { %v614_v42 = vmul.f32 0.5, %v1873_v39  ;;  %1311 = vst.msk [vmem:[%s2124_s4 + $0x8] sm:$0xff] %vm691_vm2, %v1873_v39  ;;  %v582_v43 = vadd.f32 %v1593_v41, %v1397_v34  ;;  %v576_v44 = vpop.f32.mrb[11].mxu1  ;;  %v30_v41 = vld [vmem:[%s2125_s1 + $0x28] sm:$0xff] }
 0x371   :  { %v613_v45 = vmul.f32 0.5, %v1875_v40  ;;  %1310 = vst.msk [vmem:[%s2124_s4] sm:$0xff] %vm691_vm2, %v1875_v40  ;;  %v577_v46 = vadd.f32 %v1397_v34, %v576_v44 }
 0x372   :  { %v1889_v47 = vmax.f32 %v582_v43, 0.0  ;;  %v623_v51 = vmul.f32 1.442695, %v614_v42  ;;  %v31_v42 = vld [vmem:[%s2125_s1 + $0x30] sm:$0xff] }
 0x373   :  { %v621_v48 = vmul.f32 1.442695, %v613_v45  ;;  %v1891_v49 = vmax.f32 %v577_v46, 0.0  ;;  %v1596_v50 = vpop.f32.mrb[12].mxu1 }
 0x374   :  { %v616_v52 = vmul.f32 0.5, %v1889_v47  ;;  %1313 = vst.msk [vmem:[%s2124_s4 + $0x18] sm:$0xff] %vm691_vm2, %v1889_v47  ;;  %v592_v53 = vadd.f32 %v1596_v50, %v1397_v34  ;;  %v586_v54 = vpop.f32.mrb[13].mxu1 }
 0x375   :  { %1693 = vpow2.f32 %v621_v48  ;;  %v615_v55 = vmul.f32 0.5, %v1891_v49  ;;  %1312 = vst.msk [vmem:[%s2124_s4 + $0x10] sm:$0xff] %vm691_vm2, %v1891_v49  ;;  %v587_v56 = vadd.f32 %v1397_v34, %v586_v54 }
 0x376   :  { %v1905_v57 = vmax.f32 %v592_v53, 0.0  ;;  %1695 = vpow2.f32 %v623_v51  ;;  %v627_v61 = vmul.f32 1.442695, %v616_v52 }
 0x377   :  { %v625_v58 = vmul.f32 1.442695, %v615_v55  ;;  %v1907_v59 = vmax.f32 %v587_v56, 0.0  ;;  %v1599_v60 = vpop.f32.mrb[14].mxu1 }
 0x378   :  { %v618_v62 = vmul.f32 0.5, %v1905_v57  ;;  %1315 = vst.msk [vmem:[%s2124_s4 + $0x28] sm:$0xff] %vm691_vm2, %v1905_v57  ;;  %v602_v63 = vadd.f32 %v1599_v60, %v1397_v34  ;;  %v596_v0 = vpop.f32.mrb[15].mxu1 }
 0x379   :  { %1697 = vpow2.f32 %v625_v58  ;;  %v617_v1 = vmul.f32 0.5, %v1907_v59  ;;  %1314 = vst.msk [vmem:[%s2124_s4 + $0x20] sm:$0xff] %vm691_vm2, %v1907_v59  ;;  %v597_v2 = vadd.f32 %v1397_v34, %v596_v0 }
 0x37a   :  { %v1921_v3 = vmax.f32 %v602_v63, 0.0  ;;  %1699 = vpow2.f32 %v627_v61  ;;  %v631_v6 = vmul.f32 1.442695, %v618_v62  ;;  %v973_v62 = vld [vmem:[%s2122_s2 + $0x68] sm:$0xff]  ;;  %v974_v63 = vld [vmem:[%s2122_s2 + $0x70] sm:$0xff] }
 0x37b   :  { %v629_v4 = vmul.f32 1.442695, %v617_v1  ;;  %v1923_v5 = vmax.f32 %v597_v2, 0.0  ;;  %v1684_v0 = vpack.c.bf16 %v974_v63, %v973_v62  ;;  %v1406_v1 = vld [vmem:[%s2122_s2 + $0x94] ss:$0 sm:$0xff] }
 0x37c   :  { %1317 = vst.msk [vmem:[%s2124_s4 + $0x38] sm:$0xff] %vm691_vm2, %v1921_v3  ;;  %v620_v7 = vmul.f32 0.5, %v1921_v3 }
 0x37d   :  { %1701 = vpow2.f32 %v629_v4  ;;  %v619_v8 = vmul.f32 0.5, %v1923_v5  ;;  %1316 = vst.msk [vmem:[%s2124_s4 + $0x30] sm:$0xff] %vm691_vm2, %v1923_v5  ;;  %1685 = vmatprep.subr.bf16.mxu0 %v1684_v0 }
 0x37e   :  { %1703 = vpow2.f32 %v631_v6  ;;  %v635_v11 = vmul.f32 1.442695, %v620_v7 }
 0x37f   :  { %v1694_v9 = vpop.eup %1693  ;;  %v633_v10 = vmul.f32 1.442695, %v619_v8 }
 0x380   :  { %645 = vrot.lane.b32.xlu0 %v1694_v9, %s1741_s28  ;;  %v1696_v12 = vpop.eup %1695 }
 0x381   :  { %1705 = vpow2.f32 %v633_v10 }
 0x382   :  { %1707 = vpow2.f32 %v635_v11 }
 0x383   :  { %v1698_v13 = vpop.eup %1697 }
 0x384   :  { %649 = vrot.lane.b32.xlu1 %v1698_v13, %s1741_s28  ;;  %647 = vrot.lane.b32.xlu0 %v1696_v12, %s1741_s28  ;;  %v1700_v14 = vpop.eup %1699 }
 0x387   :  { %v1702_v15 = vpop.eup %1701 }
 0x388   :  { %651 = vrot.lane.b32.xlu1 %v1700_v14, %s1741_s28  ;;  %653 = vrot.lane.b32.xlu0 %v1702_v15, %s1741_s28  ;;  %v1704_v16 = vpop.eup %1703 }
 0x38b   :  { %v1706_v17 = vpop.eup %1705 }
 0x38c   :  { %655 = vrot.lane.b32.xlu1 %v1704_v16, %s1741_s28  ;;  %657 = vrot.lane.b32.xlu0 %v1706_v17, %s1741_s28  ;;  %v1708_v18 = vpop.eup %1707 }
 0x390   :  { %659 = vrot.lane.b32.xlu1 %v1708_v18, %s1741_s28  ;;  %1326 = vrot.lane.b32.xlu0 %v1875_v40, %s1741_s28 }
 0x394   :  { %1328 = vrot.lane.b32.xlu1 %v1873_v39, %s1741_s28  ;;  %1330 = vrot.lane.b32.xlu0 %v1891_v49, %s1741_s28 }
 0x398   :  { %1332 = vrot.lane.b32.xlu1 %v1889_v47, %s1741_s28  ;;  %1334 = vrot.lane.b32.xlu0 %v1907_v59, %s1741_s28 }
 0x39c   :  { %1336 = vrot.lane.b32.xlu1 %v1905_v57, %s1741_s28  ;;  %1338 = vrot.lane.b32.xlu0 %v1923_v5, %s1741_s28 }
 0x3a0   :  { %1340 = vrot.lane.b32.xlu1 %v1921_v3, %s1741_s28 }
 0x3f2   :  { %v646_v23 = vpop.permute.xlu0 %645 }
 0x3f3   :  { %v669_v24 = vmul.f32 %v646_v23, %v25_v22 }
 0x3f5   :  { %v677_v27 = vadd.f32 %v669_v24, %v1875_v40 }
 0x3f6   :  { %v650_v28 = vpop.permute.xlu1 %649  ;;  %v648_v29 = vpop.permute.xlu0 %647 }
 0x3f7   :  { %v671_v30 = vmul.f32 %v650_v28, %v27_v25  ;;  %v670_v31 = vmul.f32 %v648_v29, %v26_v26  ;;  %1602 = vmatprep.mubr.msk.f32.mxu0 %vm691_vm2, %v677_v27  ;;  %v1117_v26 = vld [vmem:[%s2122_s2 + $0x78] sm:$0xff]  ;;  %v1118_v27 = vld [vmem:[%s2122_s2 + $0x80] sm:$0xff]  ;;  %v1119_v29 = vld [vmem:[%s2122_s2 + $0x88] sm:$0xff] }
 0x3f8   :  { %v1688_v28 = vpack.c.bf16 %v1118_v27, %v1117_v26 }
 0x3f9   :  { %v679_v34 = vadd.f32 %v671_v30, %v1891_v49  ;;  %v678_v35 = vadd.f32 %v670_v31, %v1873_v39  ;;  %v32_v49 = vld [vmem:[%s2125_s1 + $0x38] sm:$0xff]  ;;  %v1415_v30 = vld [vmem:[%s2122_s2 + $0x95] ss:$0 sm:$0xff] }
 0x3fa   :  { %v652_v36 = vpop.permute.xlu1 %651  ;;  %v654_v37 = vpop.permute.xlu0 %653  ;;  %1689 = vmatprep.subr.bf16.mxu1 %v1688_v28 }
 0x3fb   :  { %v672_v38 = vmul.f32 %v652_v36, %v28_v32  ;;  %v673_v40 = vmul.f32 %v654_v37, %v29_v33  ;;  %1603 = vmatmul.mubr.msk.f32.vlgmr.msra.gmra.mrb[16].mxu0 %vm691_vm2, %v678_v35 }
 0x3fc   :  { %1605 = vmatprep.mubr.msk.f32.mxu0 %vm691_vm2, %v679_v34  ;;  %1687 = vmatpush3.bf16.msra.mxu0 %v1684_v0 }
 0x3fd   :  { %v680_v43 = vadd.f32 %v672_v38, %v1889_v47  ;;  %v681_v39 = vadd.f32 %v673_v40, %v1907_v59 }
 0x3fe   :  { %v656_v44 = vpop.permute.xlu1 %655  ;;  %v658_v45 = vpop.permute.xlu0 %657 }
 0x3ff   :  { %v674_v46 = vmul.f32 %v656_v44, %v30_v41  ;;  %v675_v48 = vmul.f32 %v658_v45, %v31_v42  ;;  %1606 = vmatmul.mubr.msk.f32.gmra.mrb[18].mxu0 %vm691_vm2, %v680_v43 }
 0x400   :  { %1608 = vmatprep.mubr.msk.f32.mxu0 %vm691_vm2, %v681_v39 }
 0x401   :  { %v682_v50 = vadd.f32 %v674_v46, %v1905_v57  ;;  %v683_v51 = vadd.f32 %v675_v48, %v1923_v5 }
 0x402   :  { %v660_v52 = vpop.permute.xlu1 %659  ;;  %v1327_v47 = vpop.permute.xlu0 %1326 }
 0x403   :  { %v676_v53 = vmul.f32 %v660_v52, %v32_v49  ;;  %1350 = vst.msk [vmem:[%s2126_s5] sm:$0xff] %vm691_vm2, %v1327_v47  ;;  %1609 = vmatmul.mubr.msk.f32.gmra.mrb[20].mxu0 %vm691_vm2, %v682_v50 }
 0x404   :  { %1611 = vmatprep.mubr.msk.f32.mxu0 %vm691_vm2, %v683_v51 }
 0x405   :  { %v684_v54 = vadd.f32 %v676_v53, %v1921_v3 }
 0x406   :  { %v1329_v55 = vpop.permute.xlu1 %1328  ;;  %v1331_v56 = vpop.permute.xlu0 %1330 }
 0x407   :  { %1351 = vst.msk [vmem:[%s2126_s5 + $0x8] sm:$0xff] %vm691_vm2, %v1329_v55  ;;  %1352 = vst.msk [vmem:[%s2126_s5 + $0x10] sm:$0xff] %vm691_vm2, %v1331_v56  ;;  %1612 = vmatmul.mubr.msk.f32.gmra.mrb[22].mxu0 %vm691_vm2, %v684_v54  ;;  %v1424_v55 = vld [vmem:[%s2122_s2 + $0x96] ss:$0 sm:$0xff] }
 0x40a   :  { %v1333_v57 = vpop.permute.xlu1 %1332  ;;  %v1335_v58 = vpop.permute.xlu0 %1334 }
 0x40b   :  { %1353 = vst.msk [vmem:[%s2126_s5 + $0x18] sm:$0xff] %vm691_vm2, %v1333_v57  ;;  %1354 = vst.msk [vmem:[%s2126_s5 + $0x20] sm:$0xff] %vm691_vm2, %v1335_v58 }
 0x40e   :  { %v1337_v59 = vpop.permute.xlu1 %1336  ;;  %v1339_v60 = vpop.permute.xlu0 %1338 }
 0x40f   :  { %1355 = vst.msk [vmem:[%s2126_s5 + $0x28] sm:$0xff] %vm691_vm2, %v1337_v59  ;;  %1356 = vst.msk [vmem:[%s2126_s5 + $0x30] sm:$0xff] %vm691_vm2, %v1339_v60 }
 0x412   :  { %v1341_v61 = vpop.permute.xlu1 %1340 }
 0x413   :  { %1357 = vst.msk [vmem:[%s2126_s5 + $0x38] sm:$0xff] %vm691_vm2, %v1341_v61 }
 0x4ce   :  { %v1604_v2 = vpop.f32.mrb[16].mxu0 }
 0x4cf   :  { %v788_v3 = vadd.f32 %v1604_v2, %v1406_v1  ;;  %v782_v4 = vpop.f32.mrb[17].mxu0 }
 0x4d0   :  { %v783_v5 = vadd.f32 %v1406_v1, %v782_v4 }
 0x4d1   :  { %v822_v8 = vmax.f32 %v788_v3, 0.0 }
 0x4d2   :  { %v821_v6 = vmax.f32 %v783_v5, 0.0  ;;  %v1607_v7 = vpop.f32.mrb[18].mxu0 }
 0x4d3   :  { %v798_v9 = vadd.f32 %v1607_v7, %v1406_v1  ;;  %v792_v10 = vpop.f32.mrb[19].mxu0 }
 0x4d4   :  { %v793_v11 = vadd.f32 %v1406_v1, %v792_v10  ;;  %1618 = vmatprep.mubr.msk.f32.mxu1 %vm331_vm1, %v821_v6 }
 0x4d5   :  { %1619 = vmatmul.mubr.msk.f32.vlgmr.msra.gmra.mrb[16].mxu1 %vm331_vm1, %v822_v8  ;;  %v824_v14 = vmax.f32 %v798_v9, 0.0 }
 0x4d6   :  { %v823_v12 = vmax.f32 %v793_v11, 0.0  ;;  %v1610_v13 = vpop.f32.mrb[20].mxu0  ;;  %1691 = vmatpush3.bf16.msra.mxu1 %v1688_v28 }
 0x4d7   :  { %v808_v15 = vadd.f32 %v1610_v13, %v1406_v1  ;;  %v802_v16 = vpop.f32.mrb[21].mxu0  ;;  %1650 = vmatprep.subr.mxu1 %v1119_v29 }
 0x4d8   :  { %v803_v17 = vadd.f32 %v1406_v1, %v802_v16  ;;  %1621 = vmatprep.mubr.msk.f32.mxu1 %vm331_vm1, %v823_v12  ;;  %v1433_v16 = vld [vmem:[%s2122_s2 + $0x97] ss:$0 sm:$0xff] }
 0x4d9   :  { %1622 = vmatmul.mubr.msk.f32.gmra.mrb[18].mxu1 %vm331_vm1, %v824_v14  ;;  %v826_v20 = vmax.f32 %v808_v15, 0.0 }
 0x4da   :  { %v825_v18 = vmax.f32 %v803_v17, 0.0  ;;  %v1613_v19 = vpop.f32.mrb[22].mxu0  ;;  %1651 = vmatpush3.msra.mxu1 %v1119_v29 }
 0x4db   :  { %v818_v21 = vadd.f32 %v1613_v19, %v1406_v1  ;;  %v812_v22 = vpop.f32.mrb[23].mxu0 }
 0x4dc   :  { %v813_v23 = vadd.f32 %v1406_v1, %v812_v22  ;;  %1624 = vmatprep.mubr.msk.f32.mxu1 %vm331_vm1, %v825_v18 }
 0x4dd   :  { %1625 = vmatmul.mubr.msk.f32.gmra.mrb[20].mxu1 %vm331_vm1, %v826_v20  ;;  %v828_v25 = vmax.f32 %v818_v21, 0.0 }
 0x4de   :  { %v827_v24 = vmax.f32 %v813_v23, 0.0 }
 0x4e0   :  { %1627 = vmatprep.mubr.msk.f32.mxu1 %vm331_vm1, %v827_v24 }
 0x4e1   :  { %1628 = vmatmul.mubr.msk.f32.gmra.mrb[22].mxu1 %vm331_vm1, %v828_v25 }
 0x5a8   :  { %v1620_v31 = vpop.f32.mrb[16].mxu1 }
 0x5a9   :  { %v932_v32 = vadd.f32 %v1620_v31, %v1415_v30  ;;  %v926_v33 = vpop.f32.mrb[17].mxu1 }
 0x5aa   :  { %v927_v34 = vadd.f32 %v1415_v30, %v926_v33 }
 0x5ab   :  { %v966_v37 = vmax.f32 %v932_v32, 0.0 }
 0x5ac   :  { %v965_v35 = vmax.f32 %v927_v34, 0.0  ;;  %v1623_v36 = vpop.f32.mrb[18].mxu1 }
 0x5ad   :  { %v942_v38 = vadd.f32 %v1623_v36, %v1415_v30  ;;  %v936_v40 = vpop.f32.mrb[19].mxu1 }
 0x5ae   :  { %v937_v41 = vadd.f32 %v1415_v30, %v936_v40  ;;  %1634 = vmatprep.mubr.msk.f32.mxu0 %vm331_vm1, %v965_v35 }
 0x5af   :  { %1635 = vmatmul.mubr.msk.f32.vlgmr.msra.gmra.mrb[24].mxu0 %vm331_vm1, %v966_v37  ;;  %v968_v39 = vmax.f32 %v942_v38, 0.0 }
 0x5b0   :  { %v967_v42 = vmax.f32 %v937_v41, 0.0  ;;  %v1626_v43 = vpop.f32.mrb[20].mxu1 }
 0x5b1   :  { %v952_v44 = vadd.f32 %v1626_v43, %v1415_v30  ;;  %v946_v45 = vpop.f32.mrb[21].mxu1 }
 0x5b2   :  { %v947_v46 = vadd.f32 %v1415_v30, %v946_v45  ;;  %1637 = vmatprep.mubr.msk.f32.mxu0 %vm331_vm1, %v967_v42 }
 0x5b3   :  { %1638 = vmatmul.mubr.msk.f32.gmra.mrb[26].mxu0 %vm331_vm1, %v968_v39  ;;  %v970_v50 = vmax.f32 %v952_v44, 0.0 }
 0x5b4   :  { %v969_v48 = vmax.f32 %v947_v46, 0.0  ;;  %v1629_v49 = vpop.f32.mrb[22].mxu1 }
 0x5b5   :  { %v962_v51 = vadd.f32 %v1629_v49, %v1415_v30  ;;  %v956_v52 = vpop.f32.mrb[23].mxu1 }
 0x5b6   :  { %v957_v47 = vadd.f32 %v1415_v30, %v956_v52  ;;  %1640 = vmatprep.mubr.msk.f32.mxu0 %vm331_vm1, %v969_v48 }
 0x5b7   :  { %1641 = vmatmul.mubr.msk.f32.gmra.mrb[28].mxu0 %vm331_vm1, %v970_v50  ;;  %v972_v54 = vmax.f32 %v962_v51, 0.0 }
 0x5b8   :  { %v971_v53 = vmax.f32 %v957_v47, 0.0 }
 0x5ba   :  { %1643 = vmatprep.mubr.msk.f32.mxu0 %vm331_vm1, %v971_v53 }
 0x5bb   :  { %1644 = vmatmul.mubr.msk.f32.gmra.mrb[30].mxu0 %vm331_vm1, %v972_v54 }
 0x682   :  { %v1636_v56 = vpop.f32.mrb[24].mxu0 }
 0x683   :  { %v1076_v57 = vadd.f32 %v1636_v56, %v1424_v55  ;;  %v1070_v58 = vpop.f32.mrb[25].mxu0 }
 0x684   :  { %v1071_v59 = vadd.f32 %v1424_v55, %v1070_v58 }
 0x685   :  { %v1110_v62 = vmax.f32 %v1076_v57, 0.0 }
 0x686   :  { %v1109_v60 = vmax.f32 %v1071_v59, 0.0  ;;  %v1639_v61 = vpop.f32.mrb[26].mxu0 }
 0x687   :  { %v1086_v63 = vadd.f32 %v1639_v61, %v1424_v55  ;;  %v1080_v0 = vpop.f32.mrb[27].mxu0 }
 0x688   :  { %v1081_v1 = vadd.f32 %v1424_v55, %v1080_v0  ;;  %1652 = vmatprep.mubr.msk.f32.mxu1 %vm41_vm0, %v1109_v60 }
 0x689   :  { %1653 = vmatmul.mubr.msk.f32.vlgmr.msra.gmra.mrb[24].mxu1 %vm41_vm0, %v1110_v62  ;;  %v1112_v4 = vmax.f32 %v1086_v63, 0.0 }
 0x68a   :  { %v1111_v2 = vmax.f32 %v1081_v1, 0.0  ;;  %v1642_v3 = vpop.f32.mrb[28].mxu0 }
 0x68b   :  { %v1096_v5 = vadd.f32 %v1642_v3, %v1424_v55  ;;  %v1090_v6 = vpop.f32.mrb[29].mxu0 }
 0x68c   :  { %v1091_v7 = vadd.f32 %v1424_v55, %v1090_v6  ;;  %1655 = vmatprep.mubr.msk.f32.mxu1 %vm41_vm0, %v1111_v2 }
 0x68d   :  { %1656 = vmatmul.mubr.msk.f32.gmra.mrb[26].mxu1 %vm41_vm0, %v1112_v4  ;;  %v1114_v10 = vmax.f32 %v1096_v5, 0.0 }
 0x68e   :  { %v1113_v8 = vmax.f32 %v1091_v7, 0.0  ;;  %v1645_v9 = vpop.f32.mrb[30].mxu0 }
 0x68f   :  { %v1106_v11 = vadd.f32 %v1645_v9, %v1424_v55  ;;  %v1100_v12 = vpop.f32.mrb[31].mxu0 }
 0x690   :  { %v1101_v13 = vadd.f32 %v1424_v55, %v1100_v12  ;;  %1658 = vmatprep.mubr.msk.f32.mxu1 %vm41_vm0, %v1113_v8 }
 0x691   :  { %1659 = vmatmul.mubr.msk.f32.gmra.mrb[28].mxu1 %vm41_vm0, %v1114_v10  ;;  %v1116_v15 = vmax.f32 %v1106_v11, 0.0 }
 0x692   :  { %v1115_v14 = vmax.f32 %v1101_v13, 0.0 }
 0x694   :  { %1661 = vmatprep.mubr.msk.f32.mxu1 %vm41_vm0, %v1115_v14 }
 0x695   :  { %1662 = vmatmul.mubr.msk.f32.gmra.mrb[30].mxu1 %vm41_vm0, %v1116_v15 }
 0x75c   :  { %v1654_v17 = vpop.f32.mrb[24].mxu1 }
 0x75d   :  { %v1221_v18 = vadd.f32 %v1654_v17, %v1433_v16  ;;  %v1215_v19 = vpop.f32.mrb[25].mxu1 }
 0x75e   :  { %v1216_v20 = vadd.f32 %v1433_v16, %v1215_v19 }
 0x75f   :  { %v1443_v21 = vmul.f32 -1.442695, %v1221_v18 }
 0x760   :  { %v1442_v22 = vmul.f32 -1.442695, %v1216_v20  ;;  %v1657_v23 = vpop.f32.mrb[26].mxu1 }
 0x761   :  { %1709 = vpow2.f32 %v1443_v21  ;;  %v1231_v24 = vadd.f32 %v1657_v23, %v1433_v16  ;;  %v1225_v25 = vpop.f32.mrb[27].mxu1 }
 0x762   :  { %1711 = vpow2.f32 %v1442_v22  ;;  %v1226_v26 = vadd.f32 %v1433_v16, %v1225_v25 }
 0x763   :  { %v1445_v27 = vmul.f32 -1.442695, %v1231_v24 }
 0x764   :  { %v1444_v28 = vmul.f32 -1.442695, %v1226_v26  ;;  %v1660_v29 = vpop.f32.mrb[28].mxu1 }
 0x765   :  { %1713 = vpow2.f32 %v1445_v27  ;;  %v1241_v30 = vadd.f32 %v1660_v29, %v1433_v16  ;;  %v1235_v31 = vpop.f32.mrb[29].mxu1 }
 0x766   :  { %1715 = vpow2.f32 %v1444_v28  ;;  %v1236_v32 = vadd.f32 %v1433_v16, %v1235_v31 }
 0x767   :  { %v1447_v33 = vmul.f32 -1.442695, %v1241_v30 }
 0x768   :  { %v1446_v34 = vmul.f32 -1.442695, %v1236_v32  ;;  %v1663_v35 = vpop.f32.mrb[30].mxu1 }
 0x769   :  { %1717 = vpow2.f32 %v1447_v33  ;;  %v1251_v36 = vadd.f32 %v1663_v35, %v1433_v16  ;;  %v1245_v37 = vpop.f32.mrb[31].mxu1 }
 0x76a   :  { %1719 = vpow2.f32 %v1446_v34  ;;  %v1246_v38 = vadd.f32 %v1433_v16, %v1245_v37 }
 0x76b   :  { %v1710_v40 = vpop.eup %1709  ;;  %v1449_v41 = vmul.f32 -1.442695, %v1251_v36 }
 0x76c   :  { %v1712_v42 = vpop.eup %1711  ;;  %v1279_v43 = vadd.f32 1.0, %v1710_v40  ;;  %v1448_v39 = vmul.f32 -1.442695, %v1246_v38 }
 0x76d   :  { %v1278_v44 = vadd.f32 1.0, %v1712_v42  ;;  %1721 = vpow2.f32 %v1449_v41 }
 0x76e   :  { %1723 = vrcp.f32 %v1279_v43 }
 0x76f   :  { %v1714_v45 = vpop.eup %1713  ;;  %1725 = vrcp.f32 %v1278_v44 }
 0x770   :  { %v1716_v46 = vpop.eup %1715  ;;  %v1281_v48 = vadd.f32 1.0, %v1714_v45  ;;  %1727 = vpow2.f32 %v1448_v39 }
 0x771   :  { %v1280_v49 = vadd.f32 1.0, %v1716_v46 }
 0x772   :  { %1729 = vrcp.f32 %v1281_v48 }
 0x773   :  { %v1718_v50 = vpop.eup %1717  ;;  %1731 = vrcp.f32 %v1280_v49 }
 0x774   :  { %v1720_v51 = vpop.eup %1719  ;;  %v1283_v52 = vadd.f32 1.0, %v1718_v50 }
 0x775   :  { %v1282_v47 = vadd.f32 1.0, %v1720_v51 }
 0x776   :  { %1733 = vrcp.f32 %v1283_v52 }
 0x777   :  { %v1722_v53 = vpop.eup %1721  ;;  %1735 = vrcp.f32 %v1282_v47 }
 0x778   :  { %v1724_v54 = vpop.eup %1723  ;;  %v1285_v55 = vadd.f32 1.0, %v1722_v53 }
 0x779   :  { %v1726_v56 = vpop.eup %1725  ;;  %1303 = vst.msk [vmem:[%s2127_s3 + $0x8] sm:$0xff] %vm41_vm0, %v1724_v54 }
 0x77a   :  { %v1728_v57 = vpop.eup %1727  ;;  %1302 = vst.msk [vmem:[%s2127_s3] sm:$0xff] %vm41_vm0, %v1726_v56  ;;  %1737 = vrcp.f32 %v1285_v55 }
 0x77b   :  { %v1284_v58 = vadd.f32 1.0, %v1728_v57 }
 0x77c   :  { %v1730_v59 = vpop.eup %1729 }
 0x77d   :  { %v1732_v60 = vpop.eup %1731  ;;  %1305 = vst.msk [vmem:[%s2127_s3 + $0x18] sm:$0xff] %vm41_vm0, %v1730_v59  ;;  %1739 = vrcp.f32 %v1284_v58 }
 0x77e   :  { %1304 = vst.msk [vmem:[%s2127_s3 + $0x10] sm:$0xff] %vm41_vm0, %v1732_v60 }
 0x780   :  { %v1734_v61 = vpop.eup %1733 }
 0x781   :  { %v1736_v62 = vpop.eup %1735  ;;  %1307 = vst.msk [vmem:[%s2127_s3 + $0x28] sm:$0xff] %vm41_vm0, %v1734_v61 }
 0x782   :  { %1306 = vst.msk [vmem:[%s2127_s3 + $0x20] sm:$0xff] %vm41_vm0, %v1736_v62 }
 0x784   :  { %v1738_v63 = vpop.eup %1737 }
 0x785   :  { %1309 = vst.msk [vmem:[%s2127_s3 + $0x38] sm:$0xff] %vm41_vm0, %v1738_v63 }
 0x787   :  { %v1740_v0 = vpop.eup %1739 }
 0x788   :  { %1308 = vst.msk [vmem:[%s2127_s3 + $0x30] sm:$0xff] %vm41_vm0, %v1740_v0 }

</bundles_post_ra>
